<compile_context>
chip_gen: v6e
topology: v6e:2x2x1
jax: 0.10.0
libtpu: 0.0.40
codegen_flags: <defaults>
</compile_context>

<pallas_src>
import jax
import jax.numpy as jnp
from jax.experimental import pallas as pl
from jax.experimental.pallas import tpu as pltpu

# ---- static configuration ----
INPUT_SIZE = 16
HIDDEN1 = 32
HIDDEN2 = 32
OUTPUT_SIZE = 32
MULT = OUTPUT_SIZE // INPUT_SIZE        # residual case 1
PACK = 8                                # logical rows packed per lane-dense row
PACKED_IN = PACK * INPUT_SIZE           # 128 lanes
PACKED_H1 = PACK * HIDDEN1              # 256
PACKED_H2 = PACK * HIDDEN2              # 256
PACKED_OUT = PACK * OUTPUT_SIZE         # 256
PACKED_W1R = PACKED_H1 + PACKED_OUT     # 512 (fused [W1_bd | R_bd])
MAX_TM_P = 2048                         # packed rows / tile => 16384 logical rows


def _round_up(x, m):
    return ((x + m - 1) // m) * m


def ffnn_kernel(x_ref, w1r_ref, b1_ref, w2_ref, b2_ref, w3_ref, b3_ref, o_ref):
    x = x_ref[...]                                  # (TM_P, 128) f32
    xb = x.astype(jnp.bfloat16)

    # Fused [Linear(16,32) | residual-repeat]: (TM_P,128)@(128,512) on the MXU.
    fused = jnp.dot(xb, w1r_ref[...], preferred_element_type=jnp.float32)
    res = fused[:, PACKED_H1:]                      # identity = repeat(1,1,2)

    # tanh  (Dropout(p=0) is identity -> nothing to emit)
    h1 = jnp.tanh(fused[:, :PACKED_H1] + b1_ref[...]).astype(jnp.bfloat16)

    # Linear(32,32) -> relu   (packed block-diagonal: (256,256))
    h2 = jnp.maximum(
        jnp.dot(h1, w2_ref[...], preferred_element_type=jnp.float32) + b2_ref[...],
        0.0,
    ).astype(jnp.bfloat16)

    # Linear(32,32)           (packed: (256,256))
    out = jnp.dot(h2, w3_ref[...], preferred_element_type=jnp.float32) + b3_ref[...]

    o_ref[...] = out + res


def _pack_params(params):
    """8x block-diagonal bf16 weights, fused residual matrix, tiled f32 biases."""
    w1, b1, w2, b2, w3, b3 = params
    eye_p = jnp.eye(PACK, dtype=jnp.float32)
    w1_bd = jnp.kron(eye_p, w1)                               # (128, 256)
    w2_bd = jnp.kron(eye_p, w2)                               # (256, 256)
    w3_bd = jnp.kron(eye_p, w3)                               # (256, 256)
    # residual "repeat along last dim" as a (16,32) 0/1 matrix, block-diag'd,
    # then concatenated onto W1 so one matmul produces both h1-pre and identity.
    r_small = jnp.concatenate(
        [jnp.eye(INPUT_SIZE, dtype=jnp.float32)] * MULT, axis=1)  # (16, 32)
    r_bd = jnp.kron(eye_p, r_small)                           # (128, 256)
    w1r_bd = jnp.concatenate([w1_bd, r_bd], axis=1)           # (128, 512)

    b1_bd = jnp.tile(b1, (1, PACK))                           # (1, 256) f32
    b2_bd = jnp.tile(b2, (1, PACK))                           # (1, 256) f32
    b3_bd = jnp.tile(b3, (1, PACK))                           # (1, 256) f32
    return (w1r_bd.astype(jnp.bfloat16), b1_bd,
            w2_bd.astype(jnp.bfloat16), b2_bd,
            w3_bd.astype(jnp.bfloat16), b3_bd)


def ffnn_forward(nn_input, params):
    """nn_input: (B, S, INPUT_SIZE) float32 -> (B, S, OUTPUT_SIZE) float32."""
    B, S, D = nn_input.shape
    assert D == INPUT_SIZE
    M = B * S

    # -- lane-dense packing: view (M,16) rows as (m_packed,128) packed rows --
    # Pad only to a multiple of PACK (8 logical rows); no padding to the tile
    # size - the partial last grid block is masked by Pallas.
    m_pad = _round_up(M, PACK)
    x2d = nn_input.reshape(M, INPUT_SIZE)
    if m_pad != M:
        x2d = jnp.pad(x2d, ((0, m_pad - M), (0, 0)))
    m_packed = m_pad // PACK
    xp = x2d.reshape(m_packed, PACKED_IN)            # free, contiguous reshape

    # Tile size: as large as possible for DMA amortization, but keep >= 2 grid
    # steps when the data allows it (v7x megacore sharding), multiple of 8.
    tm_p = min(MAX_TM_P, max(8, _round_up(pl.cdiv(m_packed, 2), 8)))
    grid = (pl.cdiv(m_packed, tm_p),)

    w1r_bd, b1_bd, w2_bd, b2_bd, w3_bd, b3_bd = _pack_params(params)

    resident = lambda shape: pl.BlockSpec(shape, lambda i: (0, 0))

    out_p = pl.pallas_call(
        ffnn_kernel,
        out_shape=jax.ShapeDtypeStruct((m_packed, PACKED_OUT), jnp.float32),
        grid=grid,
        in_specs=[
            pl.BlockSpec((tm_p, PACKED_IN), lambda i: (i, 0)),   # x tiles
            resident((PACKED_IN, PACKED_W1R)),                   # [W1_bd|R_bd]
            resident((1, PACKED_H1)),                            # b1
            resident((PACKED_H1, PACKED_H2)),                    # W2_bd
            resident((1, PACKED_H2)),                            # b2
            resident((PACKED_H2, PACKED_OUT)),                   # W3_bd
            resident((1, PACKED_OUT)),                           # b3
        ],
        out_specs=pl.BlockSpec((tm_p, PACKED_OUT), lambda i: (i, 0)),
        compiler_params=pltpu.CompilerParams(
            dimension_semantics=("parallel",),      # shard tiles on v7x's 2 TCs
            vmem_limit_bytes=40 * 1024 * 1024,      # ~16 MiB used; safe on v7x
        ),
    )(xp, w1r_bd, b1_bd, w2_bd, b2_bd, w3_bd, b3_bd)

    out2d = out_p.reshape(m_pad, OUTPUT_SIZE)        # free unpack reshape
    if m_pad != M:
        out2d = out2d[:M]                            # only if M % 8 != 0
    return out2d.reshape(B, S, OUTPUT_SIZE)


def init_params(key):
    """Deterministic parameter init (PyTorch-Linear-style uniform bounds)."""
    ks = jax.random.split(key, 6)

    def linear(kw, kb, fan_in, fan_out):
        bound = 1.0 / jnp.sqrt(fan_in)
        w = jax.random.uniform(kw, (fan_in, fan_out), jnp.float32, -bound, bound)
        b = jax.random.uniform(kb, (1, fan_out), jnp.float32, -bound, bound)
        return w, b

    w1, b1 = linear(ks[0], ks[1], INPUT_SIZE, HIDDEN1)
    w2, b2 = linear(ks[2], ks[3], HIDDEN1, HIDDEN2)
    w3, b3 = linear(ks[4], ks[5], HIDDEN2, OUTPUT_SIZE)
    return (w1, b1, w2, b2, w3, b3)


def ffnn_reference(nn_input, params):
    """Pure-JAX f32 reference of the PyTorch forward (for sanity check)."""
    w1, b1, w2, b2, w3, b3 = params
    h1 = jnp.tanh(nn_input @ w1 + b1[0])
    h2 = jax.nn.relu(h1 @ w2 + b2[0])
    out = h2 @ w3 + b3[0]
    identity = jnp.tile(nn_input, (1, 1, MULT))
    return identity + out


if __name__ == "__main__":
    key = jax.random.PRNGKey(0)
    kx, kp = jax.random.split(key)

    B, S = 2, 8
    nn_input = jax.random.normal(kx, (B, S, INPUT_SIZE), jnp.float32)
    params = init_params(kp)

    out = ffnn_forward(nn_input, params)
    out = jax.block_until_ready(out)

    ref = ffnn_reference(nn_input, params)
    assert out.shape == (B, S, OUTPUT_SIZE)
    # Matmuls run with bf16 operands / f32 accumulation -> ~0.4% per-op
    # rounding vs. the f32 reference; tolerance loosened accordingly.
    assert jnp.allclose(out, ref, atol=5e-2, rtol=5e-2)

    print("KERNEL_OK")
</pallas_src>

<mosaic_0001>
module attributes {stable_mosaic.version = 11 : i64} {
  func.func @ffnn_kernel(%arg0: i32, %arg1: memref<8x128xf32, #tpu.memory_space<vmem>>, %arg2: memref<128x512xbf16, #tpu.memory_space<vmem>>, %arg3: memref<1x256xf32, #tpu.memory_space<vmem>>, %arg4: memref<256x256xbf16, #tpu.memory_space<vmem>>, %arg5: memref<1x256xf32, #tpu.memory_space<vmem>>, %arg6: memref<256x256xbf16, #tpu.memory_space<vmem>>, %arg7: memref<1x256xf32, #tpu.memory_space<vmem>>, %arg8: memref<8x256xf32, #tpu.memory_space<vmem>>) attributes {dimension_semantics = [#tpu.dimension_semantics<parallel>], iteration_bounds = array<i64: 1>, scalar_prefetch = 0 : i64, scratch_operands = 0 : i64, tpu.core_type = #tpu.core_type<tc>, window_params = [{transform_indices = @transform_0, window_bounds = array<i64: 8, 128>}, {pipeline_mode = #tpu.pipeline_mode<synchronous>, transform_indices = @transform_1, window_bounds = array<i64: 128, 512>}, {pipeline_mode = #tpu.pipeline_mode<synchronous>, transform_indices = @transform_2, window_bounds = array<i64: 1, 256>}, {pipeline_mode = #tpu.pipeline_mode<synchronous>, transform_indices = @transform_3, window_bounds = array<i64: 256, 256>}, {pipeline_mode = #tpu.pipeline_mode<synchronous>, transform_indices = @transform_4, window_bounds = array<i64: 1, 256>}, {pipeline_mode = #tpu.pipeline_mode<synchronous>, transform_indices = @transform_5, window_bounds = array<i64: 256, 256>}, {pipeline_mode = #tpu.pipeline_mode<synchronous>, transform_indices = @transform_6, window_bounds = array<i64: 1, 256>}, {transform_indices = @transform_7, window_bounds = array<i64: 8, 256>}]} {
    %c0 = arith.constant 0 : index
    %c0_0 = arith.constant 0 : index
    %0 = vector.load %arg1[%c0, %c0_0] : memref<8x128xf32, #tpu.memory_space<vmem>>, vector<8x128xf32>
    %1 = arith.truncf %0 : vector<8x128xf32> to vector<8x128xbf16>
    %c0_1 = arith.constant 0 : index
    %c0_2 = arith.constant 0 : index
    %2 = vector.load %arg2[%c0_1, %c0_2] : memref<128x512xbf16, #tpu.memory_space<vmem>>, vector<128x512xbf16>
    %cst = arith.constant dense<0.000000e+00> : vector<8x512xf32>
    %3 = tpu.matmul %1, %2, %cst {dimension_numbers = #tpu.dot_dimension_numbers<[1], [0], [0], [1], [0, 0, 1, 1], [], []>} : vector<8x128xbf16>, vector<128x512xbf16>, vector<8x512xf32> -> vector<8x512xf32>
    %4 = vector.extract_strided_slice %3 {offsets = [0, 256], sizes = [8, 256], strides = [1, 1]} : vector<8x512xf32> to vector<8x256xf32>
    %5 = vector.extract_strided_slice %3 {offsets = [0, 0], sizes = [8, 256], strides = [1, 1]} : vector<8x512xf32> to vector<8x256xf32>
    %c0_3 = arith.constant 0 : index
    %c0_4 = arith.constant 0 : index
    %6 = vector.load %arg3[%c0_3, %c0_4] : memref<1x256xf32, #tpu.memory_space<vmem>>, vector<1x256xf32>
    %7 = vector.broadcast %6 : vector<1x256xf32> to vector<8x256xf32>
    %8 = arith.addf %5, %7 : vector<8x256xf32>
    %9 = math.tanh %8 : vector<8x256xf32>
    %10 = arith.truncf %9 : vector<8x256xf32> to vector<8x256xbf16>
    %c0_5 = arith.constant 0 : index
    %c0_6 = arith.constant 0 : index
    %11 = vector.load %arg4[%c0_5, %c0_6] : memref<256x256xbf16, #tpu.memory_space<vmem>>, vector<256x256xbf16>
    %cst_7 = arith.constant dense<0.000000e+00> : vector<8x256xf32>
    %12 = tpu.matmul %10, %11, %cst_7 {dimension_numbers = #tpu.dot_dimension_numbers<[1], [0], [0], [1], [0, 0, 1, 1], [], []>} : vector<8x256xbf16>, vector<256x256xbf16>, vector<8x256xf32> -> vector<8x256xf32>
    %c0_8 = arith.constant 0 : index
    %c0_9 = arith.constant 0 : index
    %13 = vector.load %arg5[%c0_8, %c0_9] : memref<1x256xf32, #tpu.memory_space<vmem>>, vector<1x256xf32>
    %14 = vector.broadcast %13 : vector<1x256xf32> to vector<8x256xf32>
    %15 = arith.addf %12, %14 : vector<8x256xf32>
    %cst_10 = arith.constant 0.000000e+00 : f32
    %16 = vector.broadcast %cst_10 : f32 to vector<8x256xf32>
    %17 = arith.maximumf %15, %16 : vector<8x256xf32>
    %18 = arith.truncf %17 : vector<8x256xf32> to vector<8x256xbf16>
    %c0_11 = arith.constant 0 : index
    %c0_12 = arith.constant 0 : index
    %19 = vector.load %arg6[%c0_11, %c0_12] : memref<256x256xbf16, #tpu.memory_space<vmem>>, vector<256x256xbf16>
    %cst_13 = arith.constant dense<0.000000e+00> : vector<8x256xf32>
    %20 = tpu.matmul %18, %19, %cst_13 {dimension_numbers = #tpu.dot_dimension_numbers<[1], [0], [0], [1], [0, 0, 1, 1], [], []>} : vector<8x256xbf16>, vector<256x256xbf16>, vector<8x256xf32> -> vector<8x256xf32>
    %c0_14 = arith.constant 0 : index
    %c0_15 = arith.constant 0 : index
    %21 = vector.load %arg7[%c0_14, %c0_15] : memref<1x256xf32, #tpu.memory_space<vmem>>, vector<1x256xf32>
    %22 = vector.broadcast %21 : vector<1x256xf32> to vector<8x256xf32>
    %23 = arith.addf %20, %22 : vector<8x256xf32>
    %24 = arith.addf %23, %4 : vector<8x256xf32>
    %c0_16 = arith.constant 0 : index
    %c0_17 = arith.constant 0 : index
    %25 = vector.load %arg8[%c0_16, %c0_17] : memref<8x256xf32, #tpu.memory_space<vmem>>, vector<8x256xf32>
    tpu.vector_store %arg8[%c0_16, %c0_17], %24 {strides = array<i32>} : memref<8x256xf32, #tpu.memory_space<vmem>>, vector<8x256xf32>,
    return
  }
  func.func @transform_0(%arg0: i32) -> (i32, i32) {
    %c0_i32 = arith.constant 0 : i32
    %c0_i32_0 = arith.constant 0 : i32
    return %arg0, %c0_i32 : i32, i32
  }
  func.func @transform_1(%arg0: i32) -> (i32, i32) {
    %c0_i32 = arith.constant 0 : i32
    %c0_i32_0 = arith.constant 0 : i32
    %c0_i32_1 = arith.constant 0 : i32
    return %c0_i32, %c0_i32_0 : i32, i32
  }
  func.func @transform_2(%arg0: i32) -> (i32, i32) {
    %c0_i32 = arith.constant 0 : i32
    %c0_i32_0 = arith.constant 0 : i32
    %c0_i32_1 = arith.constant 0 : i32
    return %c0_i32, %c0_i32_0 : i32, i32
  }
  func.func @transform_3(%arg0: i32) -> (i32, i32) {
    %c0_i32 = arith.constant 0 : i32
    %c0_i32_0 = arith.constant 0 : i32
    %c0_i32_1 = arith.constant 0 : i32
    return %c0_i32, %c0_i32_0 : i32, i32
  }
  func.func @transform_4(%arg0: i32) -> (i32, i32) {
    %c0_i32 = arith.constant 0 : i32
    %c0_i32_0 = arith.constant 0 : i32
    %c0_i32_1 = arith.constant 0 : i32
    return %c0_i32, %c0_i32_0 : i32, i32
  }
  func.func @transform_5(%arg0: i32) -> (i32, i32) {
    %c0_i32 = arith.constant 0 : i32
    %c0_i32_0 = arith.constant 0 : i32
    %c0_i32_1 = arith.constant 0 : i32
    return %c0_i32, %c0_i32_0 : i32, i32
  }
  func.func @transform_6(%arg0: i32) -> (i32, i32) {
    %c0_i32 = arith.constant 0 : i32
    %c0_i32_0 = arith.constant 0 : i32
    %c0_i32_1 = arith.constant 0 : i32
    return %c0_i32, %c0_i32_0 : i32, i32
  }
  func.func @transform_7(%arg0: i32) -> (i32, i32) {
    %c0_i32 = arith.constant 0 : i32
    %c0_i32_0 = arith.constant 0 : i32
    return %arg0, %c0_i32 : i32, i32
  }
}

</mosaic_0001>

<bundles_post_ra>
// kernel: tpu_custom_call.1
= control target key start
LH: loop header
LB: loop body
LE: loop exit
PB: predicated region body
PF: predicated region fallthrough
CT: control target
= control target key end

     0   :  { %12 = vsyncpa [#allocation3], 0  ;;  %s1372_s0 = inlined_call_operand.hbm [shape: f32[2,128], index: 0, kind: input, shape index: {}]   ;;  %s1373_s1 = inlined_call_operand.hbm [shape: bf16[128,512], index: 1, kind: input, shape index: {}]   ;;  %s1374_s2 = inlined_call_operand.vmem [shape: f32[1,256], index: 2, kind: input, shape index: {}]   ;;  %s1375_s3 = inlined_call_operand.hbm [shape: bf16[256,256], index: 3, kind: input, shape index: {}]   ;;  %s1376_s4 = inlined_call_operand.vmem [shape: f32[1,256], index: 4, kind: input, shape index: {}]   ;;  %s1377_s5 = inlined_call_operand.hbm [shape: bf16[256,256], index: 5, kind: input, shape index: {}]   ;;  %s1378_s6 = inlined_call_operand.vmem [shape: f32[1,256], index: 6, kind: input, shape index: {}]   ;;  %s1379_s7 = inlined_call_operand.hbm [shape: f32[2,256], index: 7, kind: output, shape index: {}]  }
   0x1   :  { %13 = vsyncpa [#allocation6], 0 }
   0x2   :  { %14 = vsyncpa [#allocation9], 0 }
   0x3   :  { %15 = vsyncpa [#allocation4], 0 }
   0x4   :  { %20 = vsyncadd [#allocation3], 96  ;;  %s1289_s24 = smov [#allocation5]  }
   0x5   :  { %s33_s25 = sshll.u32 %s1289_s24, 4  ;;  %s34_s25 = int_to_ptr.vmem [resolvable:$true] %s33_s25 }
   0x6   :  { %s1189_s26 = scalar_lea.vmem %s34_s25, 4096  ;;  %p1194_p1 = scmp.lt.s32.totalorder %s34_s25, %s34_s25 }
   0x7   :  { %p1190_p0 = scmp.ne.s32.totalorder %s34_s25, %s1189_s26  ;;  %p1195_p2 = scmp.lt.s32.totalorder %s1189_s26, %s1189_s26 }
   0x9   :  { %p1196_p3 = por %p1195_p2, %p1194_p1 }
   0xb   :  { %p1197_p4 = pnand %p1196_p3, %p1190_p0 }
   0xd   :  { %1200 = shalt.err (!%p1197_p4)
}
   0xe   :  { %s1290_s27 = smov 256   ;;  %s1291_s28 = smov 16  }
   0xf   :  { %39 = dma.hbm_to_vmem [thread:$0]  %s1373_s1, 4096, %s34_s25, [#allocation6], %s1290_s27, %s1290_s27, %s1291_s28  }
  0x10   :  { %s1292_s8 = smov [#allocation2]  }
  0x11   :  { %s21_s9 = sshll.u32 %s1292_s8, 4  ;;  %s22_s9 = int_to_ptr.vmem [resolvable:$true] %s21_s9 }
  0x12   :  { %s1209_s10 = scalar_lea.vmem %s22_s9, 32  ;;  %s1213_s11 = scalar_lea.vmem %s22_s9, 128 }
  0x13   :  { %p1210_p5 = scmp.ne.s32.totalorder %s22_s9, %s1209_s10  ;;  %p1214_p6 = scmp.lt.s32.totalorder %s22_s9, %s22_s9 }
  0x14   :  { %p1215_p7 = scmp.lt.s32.totalorder %s1213_s11, %s1209_s10 }
  0x16   :  { %p1216_p8 = por %p1215_p7, %p1214_p6 }
  0x18   :  { %p1217_p9 = pnand %p1216_p8, %p1210_p5 }
  0x1a   :  { %1220 = shalt.err (!%p1217_p9)
}
  0x1b   :  { %s1293_s12 = smov 32   ;;  %s1294_s13 = smov 2  }
  0x1c   :  { %27 = dma.hbm_to_vmem [thread:$0]  %s1372_s0, 32, %s22_s9, [#allocation3], %s1293_s12, %s1293_s12, %s1294_s13  }
  0x1d   :  { %s1295_s16 = smov [#allocation7]  }
  0x1e   :  { %s47_s17 = sshll.u32 %s1295_s16, 4  ;;  %s48_s17 = int_to_ptr.vmem [resolvable:$true] %s47_s17 }
  0x1f   :  { %s1229_s1 = scalar_lea.vmem %s48_s17, 4096  ;;  %p1234_p11 = scmp.lt.s32.totalorder %s48_s17, %s48_s17 }
  0x20   :  { %p1230_p10 = scmp.ne.s32.totalorder %s48_s17, %s1229_s1  ;;  %p1235_p12 = scmp.lt.s32.totalorder %s1229_s1, %s1229_s1 }
  0x22   :  { %p1236_p13 = por %p1235_p12, %p1234_p11 }
  0x24   :  { %p1237_p0 = pnand %p1236_p13, %p1230_p10 }
  0x26   :  { %1240 = shalt.err (!%p1237_p0)
}
  0x27   :  { %s1296_s18 = smov 128   ;;  %s1297_s19 = smov 8  }
  0x28   :  { %53 = dma.hbm_to_vmem [thread:$0]  %s1375_s3, 4096, %s48_s17, [#allocation6], %s1296_s18, %s1296_s18, %s1297_s19  }
  0x29   :  { %s1298_s22 = smov [#allocation8]  }
  0x2a   :  { %s61_s23 = sshll.u32 %s1298_s22, 4  ;;  %s62_s23 = int_to_ptr.vmem [resolvable:$true] %s61_s23 }
  0x2b   :  { %s1249_s0 = scalar_lea.vmem %s62_s23, 4096  ;;  %p1254_p2 = scmp.lt.s32.totalorder %s62_s23, %s62_s23 }
  0x2c   :  { %p1250_p1 = scmp.ne.s32.totalorder %s62_s23, %s1249_s0  ;;  %p1255_p3 = scmp.lt.s32.totalorder %s1249_s0, %s1249_s0 }
  0x2e   :  { %p1256_p4 = por %p1255_p3, %p1254_p2 }
  0x30   :  { %p1257_p5 = pnand %p1256_p4, %p1250_p1 }
  0x32   :  { %1260 = shalt.err (!%p1257_p5)
}
  0x33   :  { %67 = dma.hbm_to_vmem [thread:$0]  %s1377_s5, 4096, %s62_s23, [#allocation9], %s1296_s18, %s1296_s18, %s1297_s19  }
  0x34   :  { %1281 = dma.done.wait [#allocation3], 128  }
  0x35   :  { %1282 = vsyncadd [#allocation3], 4294967168 }
  0x36   :  { %1283 = dma.done.wait [#allocation6], 8192  }
  0x37   :  { %1284 = vsyncadd [#allocation6], 4294959104 }
  0x38   :  { %1285 = dma.done.wait [#allocation9], 4096  }
  0x39   :  { %1286 = vsyncadd [#allocation9], 4294963200  ;;  %v1299_v0 = vmov 0   ;;  %v1033_v1 = vld [vmem:[#allocation5 + $0xe4] ss:$16 sps:$4 sm:$0xff]   ;;  %v83_v17 = vld [vmem:[#allocation2] sm:$0xff] }
  0x3a   :  { %309 = vmatprep.mubr.bf16.mxu0 %v1299_v0  ;;  %350 = vmatprep.mubr.bf16.mxu1 %v1299_v0  ;;  %v1035_v2 = vld [vmem:[#allocation5 + $0xe0] ss:$16 sps:$4 sm:$0xff]   ;;  %v1036_v3 = vld [vmem:[#allocation5 + $0xc4] ss:$16 sps:$4 sm:$0xff]   ;;  %v1356_v20 = vpack.c.bf16 %v83_v17, %v83_v17  ;;  %v1105_v51 = vld [vmem:[#allocation5 + $0xec] ss:$16 sps:$4 sm:$0xff]  }
  0x3b   :  { %277 = vmatprep.subr.bf16.mxu0 %v1033_v1  ;;  %v1038_v4 = vld [vmem:[#allocation5 + $0xc0] ss:$16 sps:$4 sm:$0xff]   ;;  %v1039_v5 = vld [vmem:[#allocation5 + $0xa4] ss:$16 sps:$4 sm:$0xff]   ;;  %v1107_v52 = vld [vmem:[#allocation5 + $0xe8] ss:$16 sps:$4 sm:$0xff]   ;;  %318 = vmatprep.subr.bf16.mxu1 %v1105_v51 }
  0x3c   :  { %278 = vmatpush1.bf16.msra.mxu0 %v1035_v2  ;;  %v1041_v6 = vld [vmem:[#allocation5 + $0xa0] ss:$16 sps:$4 sm:$0xff]   ;;  %v1042_v7 = vld [vmem:[#allocation5 + $0x84] ss:$16 sps:$4 sm:$0xff]   ;;  %v1108_v53 = vld [vmem:[#allocation5 + $0xcc] ss:$16 sps:$4 sm:$0xff]   ;;  %319 = vmatpush1.bf16.msra.mxu1 %v1107_v52 }
  0x3d   :  { %279 = vmatprep.subr.bf16.mxu0 %v1036_v3  ;;  %v1044_v8 = vld [vmem:[#allocation5 + $0x80] ss:$16 sps:$4 sm:$0xff]   ;;  %v1045_v9 = vld [vmem:[#allocation5 + $0x64] ss:$16 sps:$4 sm:$0xff]   ;;  %v1110_v54 = vld [vmem:[#allocation5 + $0xc8] ss:$16 sps:$4 sm:$0xff]   ;;  %320 = vmatprep.subr.bf16.mxu1 %v1108_v53 }
  0x3e   :  { %v1047_v10 = vld [vmem:[#allocation5 + $0x60] ss:$16 sps:$4 sm:$0xff]   ;;  %v1048_v11 = vld [vmem:[#allocation5 + $0x44] ss:$16 sps:$4 sm:$0xff]   ;;  %v1111_v55 = vld [vmem:[#allocation5 + $0xac] ss:$16 sps:$4 sm:$0xff]  }
  0x3f   :  { %v1050_v12 = vld [vmem:[#allocation5 + $0x40] ss:$16 sps:$4 sm:$0xff]   ;;  %v1051_v13 = vld [vmem:[#allocation5 + $0x24] ss:$16 sps:$4 sm:$0xff]   ;;  %v1113_v56 = vld [vmem:[#allocation5 + $0xa8] ss:$16 sps:$4 sm:$0xff]  }
  0x40   :  { %280 = vmatpush1.bf16.msra.mxu0 %v1038_v4  ;;  %v1053_v14 = vld [vmem:[#allocation5 + $0x20] ss:$16 sps:$4 sm:$0xff]   ;;  %v1054_v15 = vld [vmem:[#allocation5 + $0x4] ss:$16 sps:$4 sm:$0xff]   ;;  %321 = vmatpush1.bf16.msra.mxu1 %v1110_v54  ;;  %v1114_v57 = vld [vmem:[#allocation5 + $0x8c] ss:$16 sps:$4 sm:$0xff]  }
  0x41   :  { %281 = vmatprep.subr.bf16.mxu0 %v1039_v5  ;;  %v1056_v16 = vld [vmem:[#allocation5] ss:$16 sps:$4 sm:$0xff]   ;;  %v1059_v18 = vld [vmem:[#allocation7 + $0x74] ss:$8 sps:$4 sm:$0xff]   ;;  %v1062_v21 = vld [vmem:[#allocation7 + $0x64] ss:$8 sps:$4 sm:$0xff]   ;;  %322 = vmatprep.subr.bf16.mxu1 %v1111_v55 }
  0x42   :  { %v1057_v19 = vld [vmem:[#allocation7 + $0x70] ss:$8 sps:$4 sm:$0xff]   ;;  %v1060_v22 = vld [vmem:[#allocation7 + $0x60] ss:$8 sps:$4 sm:$0xff]   ;;  %v1065_v23 = vld [vmem:[#allocation7 + $0x54] ss:$8 sps:$4 sm:$0xff]  }
  0x43   :  { %v1063_v24 = vld [vmem:[#allocation7 + $0x50] ss:$8 sps:$4 sm:$0xff]   ;;  %v1068_v25 = vld [vmem:[#allocation7 + $0x44] ss:$8 sps:$4 sm:$0xff]   ;;  %v1066_v26 = vld [vmem:[#allocation7 + $0x40] ss:$8 sps:$4 sm:$0xff]  }
  0x44   :  { %282 = vmatpush1.bf16.msra.mxu0 %v1041_v6  ;;  %v1071_v27 = vld [vmem:[#allocation7 + $0x34] ss:$8 sps:$4 sm:$0xff]   ;;  %v1069_v28 = vld [vmem:[#allocation7 + $0x30] ss:$8 sps:$4 sm:$0xff]   ;;  %v1074_v29 = vld [vmem:[#allocation7 + $0x24] ss:$8 sps:$4 sm:$0xff]   ;;  %323 = vmatpush1.bf16.msra.mxu1 %v1113_v56 }
  0x45   :  { %283 = vmatprep.subr.bf16.mxu0 %v1042_v7  ;;  %v1072_v30 = vld [vmem:[#allocation7 + $0x20] ss:$8 sps:$4 sm:$0xff]   ;;  %v1077_v31 = vld [vmem:[#allocation7 + $0x14] ss:$8 sps:$4 sm:$0xff]   ;;  %v1075_v32 = vld [vmem:[#allocation7 + $0x10] ss:$8 sps:$4 sm:$0xff]   ;;  %324 = vmatprep.subr.bf16.mxu1 %v1114_v57 }
  0x46   :  { %v1080_v33 = vld [vmem:[#allocation7 + $0x4] ss:$8 sps:$4 sm:$0xff]   ;;  %v1078_v34 = vld [vmem:[#allocation7] ss:$8 sps:$4 sm:$0xff]   ;;  %v1083_v35 = vld [vmem:[#allocation7 + $0xf4] ss:$8 sps:$4 sm:$0xff]  }
  0x47   :  { %v1081_v36 = vld [vmem:[#allocation7 + $0xf0] ss:$8 sps:$4 sm:$0xff]   ;;  %v1086_v37 = vld [vmem:[#allocation7 + $0xe4] ss:$8 sps:$4 sm:$0xff]   ;;  %v1084_v38 = vld [vmem:[#allocation7 + $0xe0] ss:$8 sps:$4 sm:$0xff]  }
  0x48   :  { %284 = vmatpush1.bf16.msra.mxu0 %v1044_v8  ;;  %v1089_v39 = vld [vmem:[#allocation7 + $0xd4] ss:$8 sps:$4 sm:$0xff]   ;;  %v1087_v40 = vld [vmem:[#allocation7 + $0xd0] ss:$8 sps:$4 sm:$0xff]   ;;  %v1092_v41 = vld [vmem:[#allocation7 + $0xc4] ss:$8 sps:$4 sm:$0xff]  }
  0x49   :  { %285 = vmatprep.subr.bf16.mxu0 %v1045_v9  ;;  %v1090_v42 = vld [vmem:[#allocation7 + $0xc0] ss:$8 sps:$4 sm:$0xff]   ;;  %v1095_v43 = vld [vmem:[#allocation7 + $0xb4] ss:$8 sps:$4 sm:$0xff]   ;;  %v1093_v44 = vld [vmem:[#allocation7 + $0xb0] ss:$8 sps:$4 sm:$0xff]  }
  0x4a   :  { %v1098_v45 = vld [vmem:[#allocation7 + $0xa4] ss:$8 sps:$4 sm:$0xff]   ;;  %v1096_v46 = vld [vmem:[#allocation7 + $0xa0] ss:$8 sps:$4 sm:$0xff]   ;;  %v1101_v47 = vld [vmem:[#allocation7 + $0x94] ss:$8 sps:$4 sm:$0xff]  }
  0x4b   :  { %v1099_v48 = vld [vmem:[#allocation7 + $0x90] ss:$8 sps:$4 sm:$0xff]   ;;  %v1104_v49 = vld [vmem:[#allocation7 + $0x84] ss:$8 sps:$4 sm:$0xff]   ;;  %v1102_v50 = vld [vmem:[#allocation7 + $0x80] ss:$8 sps:$4 sm:$0xff]  }
  0x4c   :  { %286 = vmatpush1.bf16.msra.mxu0 %v1047_v10  ;;  %v1116_v58 = vld [vmem:[#allocation5 + $0x88] ss:$16 sps:$4 sm:$0xff]   ;;  %v1117_v59 = vld [vmem:[#allocation5 + $0x6c] ss:$16 sps:$4 sm:$0xff]  }
  0x4d   :  { %287 = vmatprep.subr.bf16.mxu0 %v1048_v11  ;;  %325 = vmatpush1.bf16.msra.mxu1 %v1116_v58  ;;  %v1119_v60 = vld [vmem:[#allocation5 + $0x68] ss:$16 sps:$4 sm:$0xff]   ;;  %v1120_v61 = vld [vmem:[#allocation5 + $0x4c] ss:$16 sps:$4 sm:$0xff]  }
  0x4e   :  { %326 = vmatprep.subr.bf16.mxu1 %v1117_v59  ;;  %v1122_v62 = vld [vmem:[#allocation5 + $0x48] ss:$16 sps:$4 sm:$0xff]   ;;  %v1123_v63 = vld [vmem:[#allocation5 + $0x2c] ss:$16 sps:$4 sm:$0xff]  }
  0x4f   :  { %v1125_v0 = vld [vmem:[#allocation5 + $0x28] ss:$16 sps:$4 sm:$0xff]   ;;  %v1126_v1 = vld [vmem:[#allocation5 + $0xc] ss:$16 sps:$4 sm:$0xff]  }
  0x50   :  { %288 = vmatpush1.bf16.msra.mxu0 %v1050_v12  ;;  %v1128_v2 = vld [vmem:[#allocation5 + $0x8] ss:$16 sps:$4 sm:$0xff]   ;;  %v1131_v3 = vld [vmem:[#allocation8 + $0x74] ss:$8 sps:$4 sm:$0xff]   ;;  %v1134_v5 = vld [vmem:[#allocation8 + $0x64] ss:$8 sps:$4 sm:$0xff]  }
  0x51   :  { %289 = vmatprep.subr.bf16.mxu0 %v1051_v13  ;;  %327 = vmatpush1.bf16.msra.mxu1 %v1119_v60  ;;  %v1129_v4 = vld [vmem:[#allocation8 + $0x70] ss:$8 sps:$4 sm:$0xff]   ;;  %v1132_v6 = vld [vmem:[#allocation8 + $0x60] ss:$8 sps:$4 sm:$0xff]   ;;  %v1137_v7 = vld [vmem:[#allocation8 + $0x54] ss:$8 sps:$4 sm:$0xff]  }
  0x52   :  { %328 = vmatprep.subr.bf16.mxu1 %v1120_v61  ;;  %v1135_v8 = vld [vmem:[#allocation8 + $0x50] ss:$8 sps:$4 sm:$0xff]   ;;  %v1140_v9 = vld [vmem:[#allocation8 + $0x44] ss:$8 sps:$4 sm:$0xff]   ;;  %v1138_v10 = vld [vmem:[#allocation8 + $0x40] ss:$8 sps:$4 sm:$0xff]  }
  0x53   :  { %v1143_v11 = vld [vmem:[#allocation8 + $0x34] ss:$8 sps:$4 sm:$0xff]   ;;  %v1141_v12 = vld [vmem:[#allocation8 + $0x30] ss:$8 sps:$4 sm:$0xff]   ;;  %v1146_v13 = vld [vmem:[#allocation8 + $0x24] ss:$8 sps:$4 sm:$0xff]  }
  0x54   :  { %290 = vmatpush1.bf16.msra.mxu0 %v1053_v14  ;;  %v1144_v14 = vld [vmem:[#allocation8 + $0x20] ss:$8 sps:$4 sm:$0xff]   ;;  %v1152_v17 = vld [vmem:[#allocation8 + $0x4] ss:$8 sps:$4 sm:$0xff]   ;;  %v409_v56 = vld [vmem:[%s1376_s4] sm:$0x3] }
  0x55   :  { %291 = vmatprep.subr.bf16.mxu0 %v1054_v15  ;;  %329 = vmatpush1.bf16.msra.mxu1 %v1122_v62  ;;  %v1149_v15 = vld [vmem:[#allocation8 + $0x14] ss:$8 sps:$4 sm:$0xff]   ;;  %v1174_v51 = vld [vmem:[#allocation8 + $0x80] ss:$8 sps:$4 sm:$0xff]  }
  0x56   :  { %330 = vmatprep.subr.bf16.mxu1 %v1123_v63 }
  0x58   :  { %292 = vmatpush1.bf16.msra.mxu0 %v1056_v16  ;;  %v1147_v16 = vld [vmem:[#allocation8 + $0x10] ss:$8 sps:$4 sm:$0xff]  }
  0x59   :  { %581 = vmatprep.subr.bf16.mxu0 %v1059_v18  ;;  %331 = vmatpush1.bf16.msra.mxu1 %v1125_v0  ;;  %v1150_v18 = vld [vmem:[#allocation8] ss:$8 sps:$4 sm:$0xff]  }
  0x5a   :  { %332 = vmatprep.subr.bf16.mxu1 %v1126_v1 }
  0x5b   :  { %310 = vmatmul.mubr.bf16.vlgmr.msra.gmra.mxu0 %v1356_v20 }
  0x5c   :  { %582 = vmatpush1.bf16.msra.mxu0 %v1057_v19  ;;  %v1155_v19 = vld [vmem:[#allocation8 + $0xf4] ss:$8 sps:$4 sm:$0xff]  }
  0x5d   :  { %583 = vmatprep.subr.bf16.mxu0 %v1062_v21  ;;  %333 = vmatpush1.bf16.msra.mxu1 %v1128_v2  ;;  %v1158_v21 = vld [vmem:[#allocation8 + $0xe4] ss:$8 sps:$4 sm:$0xff]  }
  0x5e   :  { %830 = vmatprep.subr.bf16.mxu1 %v1131_v3 }
  0x60   :  { %584 = vmatpush1.bf16.msra.mxu0 %v1060_v22  ;;  %351 = vmatmul.mubr.bf16.vlgmr.msra.gmra.mxu1 %v1356_v20  ;;  %v1153_v20 = vld [vmem:[#allocation8 + $0xf0] ss:$8 sps:$4 sm:$0xff]   ;;  %v1156_v22 = vld [vmem:[#allocation8 + $0xe0] ss:$8 sps:$4 sm:$0xff]  }
  0x61   :  { %585 = vmatprep.subr.bf16.mxu0 %v1065_v23  ;;  %831 = vmatpush1.bf16.msra.mxu1 %v1129_v4  ;;  %v1161_v23 = vld [vmem:[#allocation8 + $0xd4] ss:$8 sps:$4 sm:$0xff]  }
  0x62   :  { %832 = vmatprep.subr.bf16.mxu1 %v1134_v5  ;;  %v658_v5 = vld [vmem:[%s1378_s6] sm:$0x3] }
  0x64   :  { %586 = vmatpush1.bf16.msra.mxu0 %v1063_v24  ;;  %v1159_v24 = vld [vmem:[#allocation8 + $0xd0] ss:$8 sps:$4 sm:$0xff]  }
  0x65   :  { %587 = vmatprep.subr.bf16.mxu0 %v1068_v25  ;;  %833 = vmatpush1.bf16.msra.mxu1 %v1132_v6  ;;  %v1164_v25 = vld [vmem:[#allocation8 + $0xc4] ss:$8 sps:$4 sm:$0xff]  }
  0x66   :  { %834 = vmatprep.subr.bf16.mxu1 %v1137_v7  ;;  %v1300_v7 = vmov 1983009808  }
  0x68   :  { %588 = vmatpush1.bf16.msra.mxu0 %v1066_v26  ;;  %v1162_v26 = vld [vmem:[#allocation8 + $0xc0] ss:$8 sps:$4 sm:$0xff]  }
  0x69   :  { %589 = vmatprep.subr.bf16.mxu0 %v1071_v27  ;;  %835 = vmatpush1.bf16.msra.mxu1 %v1135_v8  ;;  %v1167_v27 = vld [vmem:[#allocation8 + $0xb4] ss:$8 sps:$4 sm:$0xff]   ;;  %v878_v8 = vunpack.c.l.s4 %v1300_v7 }
  0x6a   :  { %836 = vmatprep.subr.bf16.mxu1 %v1140_v9 }
  0x6c   :  { %590 = vmatpush1.bf16.msra.mxu0 %v1069_v28  ;;  %v1165_v28 = vld [vmem:[#allocation8 + $0xb0] ss:$8 sps:$4 sm:$0xff]  }
  0x6d   :  { %591 = vmatprep.subr.bf16.mxu0 %v1074_v29  ;;  %837 = vmatpush1.bf16.msra.mxu1 %v1138_v10  ;;  %v1170_v29 = vld [vmem:[#allocation8 + $0xa4] ss:$8 sps:$4 sm:$0xff]  }
  0x6e   :  { %838 = vmatprep.subr.bf16.mxu1 %v1143_v11 }
  0x70   :  { %592 = vmatpush1.bf16.msra.mxu0 %v1072_v30  ;;  %v1168_v30 = vld [vmem:[#allocation8 + $0xa0] ss:$8 sps:$4 sm:$0xff]  }
  0x71   :  { %593 = vmatprep.subr.bf16.mxu0 %v1077_v31  ;;  %839 = vmatpush1.bf16.msra.mxu1 %v1141_v12  ;;  %v361_v31 = vlaneseq  ;;  %v879_v12 = vunpack.c.0.s8 %v878_v8 }
  0x72   :  { %840 = vmatprep.subr.bf16.mxu1 %v1146_v13 }
  0x74   :  { %594 = vmatpush1.bf16.msra.mxu0 %v1075_v32  ;;  %v362_v32 = vshrl.u32 %v361_v31, 7 }
  0x75   :  { %595 = vmatprep.subr.bf16.mxu0 %v1080_v33  ;;  %841 = vmatpush1.bf16.msra.mxu1 %v1144_v14 }
  0x76   :  { %842 = vmatprep.subr.bf16.mxu1 %v1149_v15  ;;  %v363_v33 = vsub.s32 0, %v362_v32 }
  0x78   :  { %596 = vmatpush1.bf16.msra.mxu0 %v1078_v34  ;;  %v359_v34 = vld [vmem:[%s1374_s2] sm:$0x3]  ;;  %v414_v57 = vrot.slane %v409_v56, %v363_v33  ;;  %v663_v6 = vrot.slane %v658_v5, %v363_v33 }
  0x79   :  { %597 = vmatprep.subr.bf16.mxu0 %v1083_v35  ;;  %843 = vmatpush1.bf16.msra.mxu1 %v1147_v16  ;;  %v367_v35 = vsub.s32 1, %v362_v32 }
  0x7a   :  { %844 = vmatprep.subr.bf16.mxu1 %v1152_v17 }
  0x7b   :  { %v418_v58 = vrot.slane %v409_v56, %v367_v35  ;;  %v667_v9 = vrot.slane %v658_v5, %v367_v35 }
  0x7c   :  { %598 = vmatpush2.bf16.msra.mxu0 %v1081_v36  ;;  %v364_v36 = vrot.slane %v359_v34, %v363_v33 }
  0x7d   :  { %599 = vmatprep.subr.bf16.mxu0 %v1086_v37  ;;  %845 = vmatpush1.bf16.msra.mxu1 %v1150_v18  ;;  %v368_v37 = vrot.slane %v359_v34, %v367_v35  ;;  %v882_v18 = vsub.s32 %v879_v12, %v362_v32 }
  0x7e   :  { %846 = vmatprep.subr.bf16.mxu1 %v1155_v19 }
  0x80   :  { %600 = vmatpush2.bf16.msra.mxu0 %v1084_v38 }
  0x81   :  { %601 = vmatprep.subr.bf16.mxu0 %v1089_v39  ;;  %847 = vmatpush2.bf16.msra.mxu1 %v1153_v20 }
  0x82   :  { %848 = vmatprep.subr.bf16.mxu1 %v1158_v21 }
  0x84   :  { %602 = vmatpush2.bf16.msra.mxu0 %v1087_v40 }
  0x85   :  { %603 = vmatprep.subr.bf16.mxu0 %v1092_v41  ;;  %849 = vmatpush2.bf16.msra.mxu1 %v1156_v22 }
  0x86   :  { %850 = vmatprep.subr.bf16.mxu1 %v1161_v23 }
  0x88   :  { %604 = vmatpush2.bf16.msra.mxu0 %v1090_v42 }
  0x89   :  { %605 = vmatprep.subr.bf16.mxu0 %v1095_v43  ;;  %851 = vmatpush2.bf16.msra.mxu1 %v1159_v24 }
  0x8a   :  { %852 = vmatprep.subr.bf16.mxu1 %v1164_v25 }
  0x8c   :  { %606 = vmatpush2.bf16.msra.mxu0 %v1093_v44 }
  0x8d   :  { %607 = vmatprep.subr.bf16.mxu0 %v1098_v45  ;;  %853 = vmatpush2.bf16.msra.mxu1 %v1162_v26 }
  0x8e   :  { %854 = vmatprep.subr.bf16.mxu1 %v1167_v27 }
  0x90   :  { %608 = vmatpush2.bf16.msra.mxu0 %v1096_v46 }
  0x91   :  { %609 = vmatprep.subr.bf16.mxu0 %v1101_v47  ;;  %855 = vmatpush2.bf16.msra.mxu1 %v1165_v28 }
  0x92   :  { %856 = vmatprep.subr.bf16.mxu1 %v1170_v29 }
  0x94   :  { %610 = vmatpush2.bf16.msra.mxu0 %v1099_v48  ;;  %v1173_v48 = vld [vmem:[#allocation8 + $0x94] ss:$8 sps:$4 sm:$0xff]  }
  0x95   :  { %611 = vmatprep.subr.bf16.mxu0 %v1104_v49  ;;  %857 = vmatpush2.bf16.msra.mxu1 %v1168_v30  ;;  %v1171_v49 = vld [vmem:[#allocation8 + $0x90] ss:$8 sps:$4 sm:$0xff]  }
  0x96   :  { %858 = vmatprep.subr.bf16.mxu1 %v1173_v48 }
  0x98   :  { %612 = vmatpush2.bf16.msra.mxu0 %v1102_v50  ;;  %v1176_v50 = vld [vmem:[#allocation8 + $0x84] ss:$8 sps:$4 sm:$0xff]  }
  0x99   :  { %859 = vmatpush2.bf16.msra.mxu1 %v1171_v49 }
  0x9a   :  { %860 = vmatprep.subr.bf16.mxu1 %v1176_v50 }
  0x9d   :  { %861 = vmatpush2.bf16.msra.mxu1 %v1174_v51 }
 0x11b   :  { %v311_v38 = vpop.f32.mrf.mxu0 }
 0x11c   :  { %v371_v39 = vadd.f32 %v364_v36, %v311_v38 }
 0x11d   :  { %v313_v40 = vpop.f32.mrf.mxu0 }
 0x11e   :  { %v372_v41 = vadd.f32 %v368_v37, %v313_v40  ;;  %1177 = vtanh.f32 %v371_v39 }
 0x11f   :  { %v315_v42 = vpop.f32.mrf.mxu0 }
 0x120   :  { %1179 = vtanh.f32 %v372_v41  ;;  %v352_v52 = vpop.f32.mrf.mxu1 }
 0x121   :  { %v316_v43 = vpop.f32.mrf.mxu0 }
 0x122   :  { %v354_v53 = vpop.f32.mrf.mxu1 }
 0x124   :  { %v356_v54 = vpop.f32.mrf.mxu1 }
 0x126   :  { %v357_v55 = vpop.f32.mrf.mxu1 }
 0x12b   :  { %v1178_v44 = vpop.eup %1177 }
 0x12c   :  { %v375_v47 = vpack.c.bf16 %v1178_v44, %v1178_v44 }
 0x12d   :  { %v1180_v45 = vpop.eup %1179 }
 0x12e   :  { %v376_v46 = vpack.c.bf16 %v1180_v45, %v1180_v45 }
 0x130   :  { %613 = vmatprep.mubr.bf16.mxu0 %v376_v46 }
 0x131   :  { %614 = vmatmul.mubr.bf16.vlgmr.msra.gmra.mxu0 %v375_v47 }
 0x1f1   :  { %v615_v59 = vpop.f32.mrf.mxu0 }
 0x1f2   :  { %v616_v60 = vadd.f32 %v615_v59, %v414_v57 }
 0x1f3   :  { %v617_v61 = vpop.f32.mrf.mxu0 }
 0x1f4   :  { %v618_v62 = vadd.f32 %v617_v61, %v418_v58  ;;  %v622_v63 = vmax.f32 %v616_v60, 0.0 }
 0x1f5   :  { %v619_v0 = vpop.f32.mrf.mxu0 }
 0x1f6   :  { %v623_v1 = vmax.f32 %v618_v62, 0.0  ;;  %v624_v4 = vpack.c.bf16 %v622_v63, %v622_v63 }
 0x1f7   :  { %v620_v2 = vpop.f32.mrf.mxu0 }
 0x1f8   :  { %v625_v3 = vpack.c.bf16 %v623_v1, %v623_v1 }
 0x1fa   :  { %862 = vmatprep.mubr.bf16.mxu1 %v625_v3 }
 0x1fb   :  { %863 = vmatmul.mubr.bf16.vlgmr.msra.gmra.mxu1 %v624_v4 }
 0x2bb   :  { %v864_v10 = vpop.f32.mrf.mxu1 }
 0x2bc   :  { %v865_v11 = vadd.f32 %v864_v10, %v663_v6 }
 0x2bd   :  { %v866_v13 = vpop.f32.mrf.mxu1 }
 0x2be   :  { %v867_v14 = vadd.f32 %v866_v13, %v667_v9  ;;  %v871_v16 = vadd.f32 %v865_v11, %v352_v52 }
 0x2bf   :  { %v868_v15 = vpop.f32.mrf.mxu1 }
 0x2c0   :  { %v872_v17 = vadd.f32 %v867_v14, %v354_v53 }
 0x2c1   :  { %v869_v19 = vpop.f32.mrf.mxu1 }
 0x2c2   :  { %v875_v20 = vcombine.low %v871_v16, %v872_v17  ;;  %v876_v21 = vcombine.high %v871_v16, %v872_v17 }
 0x2c4   :  { %v883_v22 = vrot.slane %v875_v20, %v882_v18  ;;  %v890_v23 = vrot.slane %v876_v21, %v882_v18  ;;  %1016 = vst.sshfl [vmem:[#allocation10] sm:$0x33 pattern:$0x76325410] %v875_v20 }
 0x2c5   :  { %1017 = vst.sshfl [vmem:[#allocation10 + $0x8] sm:$0x33 pattern:$0x76325410] %v876_v21 }
 0x2c6   :  { %v891_v24 = vcombine.high %v883_v22, %v883_v22  ;;  %v892_v25 = vcombine.high %v890_v23, %v890_v23 }
 0x2c8   :  { %898 = vst [vmem:[#allocation10 + $0x4] sm:$0xf] %v891_v24  ;;  %900 = vst [vmem:[#allocation10 + $0xc] sm:$0xf] %v892_v25 }
 0x2c9   :  { %905 = vsyncadd [#allocation4], 192  ;;  %s1301_s4 = smov [#allocation10]  }
 0x2ca   :  { %s906_s6 = sshll.u32 %s1301_s4, 4  ;;  %s907_s6 = int_to_ptr.vmem [resolvable:$true] %s906_s6 }
 0x2cb   :  { %s1261_s29 = scalar_lea.vmem %s907_s6, 64  ;;  %s1265_s30 = scalar_lea.vmem %s907_s6, 256 }
 0x2cc   :  { %p1262_p6 = scmp.ne.s32.totalorder %s907_s6, %s1261_s29  ;;  %p1266_p7 = scmp.lt.s32.totalorder %s907_s6, %s907_s6 }
 0x2cd   :  { %p1267_p8 = scmp.lt.s32.totalorder %s1265_s30, %s1261_s29 }
 0x2cf   :  { %p1268_p9 = por %p1267_p8, %p1266_p7 }
 0x2d1   :  { %p1269_p10 = pnand %p1268_p9, %p1262_p6 }
 0x2d3   :  { %1272 = shalt.err (!%p1269_p10)
}
 0x2d4   :  { %s1302_s8 = smov 64   ;;  %s1303_s9 = smov 4  }
 0x2d5   :  { %912 = dma.vmem_to_hbm [thread:$0]  %s907_s6, 64, %s1379_s7, [#allocation4], %s1302_s8, %s1302_s8, %s1303_s9  }
 0x2d6   :  { %1287 = dma.done.wait [#allocation4], 256  }
 0x2d7   :  { %1288 = vsyncadd [#allocation4], 4294967040 }
 0x2d8   :  { %916 = vsyncpa [#allocation3], 1 }
 0x2d9   :  { %917 = vsyncpa [#allocation6], 1 }
 0x2da   :  { %918 = vsyncpa [#allocation9], 1 }
 0x2db   :  { %919 = vsyncpa [#allocation4], 1 }

</bundles_post_ra>
